<compile_context>
chip_gen: v7x
topology: tpu7x:2x2x1
jax: 0.10.0
libtpu: 0.0.40
codegen_flags: <defaults>
</compile_context>

<pallas_src>
import functools
import math

import jax
import jax.numpy as jnp
from jax.experimental import pallas as pl
from jax.experimental.pallas import tpu as pltpu

LOG_STD_MAX = 2.0
LOG_STD_MIN = -5.0

# Folded affine: LOG_STD_MIN + 0.5*(MAX-MIN)*(t+1) == LS_SLOPE*t + LS_SHIFT
LS_SLOPE = 0.5 * (LOG_STD_MAX - LOG_STD_MIN)      # 3.5
LS_SHIFT = LOG_STD_MIN + LS_SLOPE                 # -1.5

HIDDEN = 256


def _round_up(x, m):
    return ((x + m - 1) // m) * m


def actor_kernel(x_ref, w1_ref, b1_ref, w2_ref, b2_ref, wh_ref, bh_ref,
                 out_ref, *, act_dim):
    x = x_ref[...]

    # fc1 + relu  (MXU matmul, f32 accumulate)
    h1 = jnp.dot(x, w1_ref[...], preferred_element_type=jnp.float32) + b1_ref[...]
    h1 = jnp.maximum(h1, 0.0)

    # fc2 + relu
    h2 = jnp.dot(h1, w2_ref[...], preferred_element_type=jnp.float32) + b2_ref[...]
    h2 = jnp.maximum(h2, 0.0)

    # Fused heads: lanes [0, act_dim) -> mean, [act_dim, 2*act_dim) -> log_std.
    head = jnp.dot(h2, wh_ref[...], preferred_element_type=jnp.float32) + bh_ref[...]

    lane = jax.lax.broadcasted_iota(jnp.int32, head.shape, 1)
    is_logstd = (lane >= act_dim) & (lane < 2 * act_dim)

    squashed = LS_SLOPE * jnp.tanh(head) + LS_SHIFT   # tanh on EUP, folded affine
    out_ref[...] = jnp.where(is_logstd, squashed, head).astype(out_ref.dtype)


def actor_forward(x, params, tile_b=512):
    """x: [B, obs_dim] f32. params: dict of weights/biases. Returns (mean, log_std)."""
    B, obs_dim = x.shape
    act_dim = params["wm"].shape[1]

    # Lane-dense fused head: pad 2*act_dim up to a multiple of 128 lanes.
    head_pad = max(128, _round_up(2 * act_dim, 128))
    w_head = jnp.zeros((HIDDEN, head_pad), jnp.float32)
    w_head = w_head.at[:, :act_dim].set(params["wm"])
    w_head = w_head.at[:, act_dim:2 * act_dim].set(params["ws"])
    b_head = jnp.zeros((1, head_pad), jnp.float32)
    b_head = b_head.at[:, :act_dim].set(params["bm"])
    b_head = b_head.at[:, act_dim:2 * act_dim].set(params["bs"])

    # Batch tile: multiple of 8 sublanes, capped for VMEM safety on v7x.
    tile = min(tile_b, _round_up(max(B, 1), 8))
    tile = _round_up(tile, 8)
    b_pad = _round_up(B, tile)
    x_p = x if b_pad == B else jnp.pad(x, ((0, b_pad - B), (0, 0)))
    grid = (pl.cdiv(b_pad, tile),)

    kernel = functools.partial(actor_kernel, act_dim=act_dim)

    const = lambda i: (0, 0)        # weights/biases resident across grid steps

    out = pl.pallas_call(
        kernel,
        out_shape=jax.ShapeDtypeStruct((b_pad, head_pad), jnp.float32),
        grid=grid,
        in_specs=[
            pl.BlockSpec((tile, obs_dim), lambda i: (i, 0)),     # x
            pl.BlockSpec((obs_dim, HIDDEN), const),              # W1
            pl.BlockSpec((1, HIDDEN), const),                    # b1
            pl.BlockSpec((HIDDEN, HIDDEN), const),               # W2
            pl.BlockSpec((1, HIDDEN), const),                    # b2
            pl.BlockSpec((HIDDEN, head_pad), const),             # fused head W
            pl.BlockSpec((1, head_pad), const),                  # fused head b
        ],
        out_specs=pl.BlockSpec((tile, head_pad), lambda i: (i, 0)),
        compiler_params=pltpu.CompilerParams(
            dimension_semantics=("parallel",)),
        cost_estimate=pl.CostEstimate(
            flops=2 * b_pad * (obs_dim * HIDDEN + HIDDEN * HIDDEN
                               + HIDDEN * head_pad),
            transcendentals=b_pad * head_pad,
            bytes_accessed=4 * (b_pad * obs_dim
                                + obs_dim * HIDDEN + HIDDEN
                                + HIDDEN * HIDDEN + HIDDEN
                                + HIDDEN * head_pad + head_pad
                                + b_pad * head_pad),
        ),
    )(x_p, params["w1"], params["b1"], params["w2"], params["b2"],
      w_head, b_head)

    mean = out[:B, :act_dim]
    log_std = out[:B, act_dim:2 * act_dim]
    return mean, log_std


def init_params(key, obs_dim, act_dim):
    """Deterministic init mimicking nn.Linear's U(-1/sqrt(fan_in), 1/sqrt(fan_in))."""
    def linear(key, fan_in, fan_out):
        kw, kb = jax.random.split(key)
        bound = 1.0 / math.sqrt(fan_in)
        w = jax.random.uniform(kw, (fan_in, fan_out), jnp.float32, -bound, bound)
        b = jax.random.uniform(kb, (1, fan_out), jnp.float32, -bound, bound)
        return w, b

    k1, k2, k3, k4 = jax.random.split(key, 4)
    w1, b1 = linear(k1, obs_dim, HIDDEN)
    w2, b2 = linear(k2, HIDDEN, HIDDEN)
    wm, bm = linear(k3, HIDDEN, act_dim)
    ws, bs = linear(k4, HIDDEN, act_dim)
    return dict(w1=w1, b1=b1, w2=w2, b2=b2, wm=wm, bm=bm, ws=ws, bs=bs)


def actor_forward_ref(x, p):
    """Pure-JAX reference for correctness check."""
    h1 = jax.nn.relu(x @ p["w1"] + p["b1"])
    h2 = jax.nn.relu(h1 @ p["w2"] + p["b2"])
    mean = h2 @ p["wm"] + p["bm"]
    ls = jnp.tanh(h2 @ p["ws"] + p["bs"])
    ls = LOG_STD_MIN + 0.5 * (LOG_STD_MAX - LOG_STD_MIN) * (ls + 1.0)
    return mean, ls


if __name__ == "__main__":
    B, OBS_DIM, ACT_DIM = 2, 32, 8

    key = jax.random.PRNGKey(0)
    kx, kp = jax.random.split(key)
    x = jax.random.normal(kx, (B, OBS_DIM), jnp.float32)
    params = init_params(kp, OBS_DIM, ACT_DIM)

    mean, log_std = actor_forward(x, params)
    jax.block_until_ready((mean, log_std))

    mean_ref, log_std_ref = actor_forward_ref(x, params)
    assert mean.shape == (B, ACT_DIM) and log_std.shape == (B, ACT_DIM)
    assert jnp.allclose(mean, mean_ref, atol=1e-5, rtol=1e-5)
    assert jnp.allclose(log_std, log_std_ref, atol=1e-5, rtol=1e-5)

    # Secondary check: multi-step batch grid with padding (exercises pipelining).
    B2 = 300
    x2 = jax.random.normal(jax.random.PRNGKey(1), (B2, OBS_DIM), jnp.float32)
    m2, l2 = actor_forward(x2, params, tile_b=128)
    jax.block_until_ready((m2, l2))
    m2_ref, l2_ref = actor_forward_ref(x2, params)
    assert jnp.allclose(m2, m2_ref, atol=1e-5, rtol=1e-5)
    assert jnp.allclose(l2, l2_ref, atol=1e-5, rtol=1e-5)

    print("KERNEL_OK")
</pallas_src>

<mosaic_0001>
module attributes {stable_mosaic.version = 11 : i64} {
  func.func @actor_kernel(%arg0: i32, %arg1: memref<8x32xf32, #tpu.memory_space<vmem>>, %arg2: memref<32x256xf32, #tpu.memory_space<vmem>>, %arg3: memref<1x256xf32, #tpu.memory_space<vmem>>, %arg4: memref<256x256xf32, #tpu.memory_space<vmem>>, %arg5: memref<1x256xf32, #tpu.memory_space<vmem>>, %arg6: memref<256x128xf32, #tpu.memory_space<vmem>>, %arg7: memref<1x128xf32, #tpu.memory_space<vmem>>, %arg8: memref<8x128xf32, #tpu.memory_space<vmem>>) attributes {dimension_semantics = [#tpu.dimension_semantics<parallel>], iteration_bounds = array<i64: 1>, scalar_prefetch = 0 : i64, scratch_operands = 0 : i64, tpu.core_type = #tpu.core_type<tc>, window_params = [{transform_indices = @transform_0, window_bounds = array<i64: 8, 32>}, {pipeline_mode = #tpu.pipeline_mode<synchronous>, transform_indices = @transform_1, window_bounds = array<i64: 32, 256>}, {pipeline_mode = #tpu.pipeline_mode<synchronous>, transform_indices = @transform_2, window_bounds = array<i64: 1, 256>}, {pipeline_mode = #tpu.pipeline_mode<synchronous>, transform_indices = @transform_3, window_bounds = array<i64: 256, 256>}, {pipeline_mode = #tpu.pipeline_mode<synchronous>, transform_indices = @transform_4, window_bounds = array<i64: 1, 256>}, {pipeline_mode = #tpu.pipeline_mode<synchronous>, transform_indices = @transform_5, window_bounds = array<i64: 256, 128>}, {pipeline_mode = #tpu.pipeline_mode<synchronous>, transform_indices = @transform_6, window_bounds = array<i64: 1, 128>}, {transform_indices = @transform_7, window_bounds = array<i64: 8, 128>}]} {
    %c0 = arith.constant 0 : index
    %c0_0 = arith.constant 0 : index
    %0 = vector.load %arg1[%c0, %c0_0] : memref<8x32xf32, #tpu.memory_space<vmem>>, vector<8x32xf32>
    %c0_1 = arith.constant 0 : index
    %c0_2 = arith.constant 0 : index
    %1 = vector.load %arg2[%c0_1, %c0_2] : memref<32x256xf32, #tpu.memory_space<vmem>>, vector<32x256xf32>
    %cst = arith.constant dense<0.000000e+00> : vector<8x256xf32>
    %2 = tpu.matmul %0, %1, %cst {dimension_numbers = #tpu.dot_dimension_numbers<[1], [0], [0], [1], [0, 0, 1, 1], [], []>} : vector<8x32xf32>, vector<32x256xf32>, vector<8x256xf32> -> vector<8x256xf32>
    %c0_3 = arith.constant 0 : index
    %c0_4 = arith.constant 0 : index
    %3 = vector.load %arg3[%c0_3, %c0_4] : memref<1x256xf32, #tpu.memory_space<vmem>>, vector<1x256xf32>
    %4 = vector.broadcast %3 : vector<1x256xf32> to vector<8x256xf32>
    %5 = arith.addf %2, %4 : vector<8x256xf32>
    %cst_5 = arith.constant 0.000000e+00 : f32
    %6 = vector.broadcast %cst_5 : f32 to vector<8x256xf32>
    %7 = arith.maximumf %5, %6 : vector<8x256xf32>
    %c0_6 = arith.constant 0 : index
    %c0_7 = arith.constant 0 : index
    %8 = vector.load %arg4[%c0_6, %c0_7] : memref<256x256xf32, #tpu.memory_space<vmem>>, vector<256x256xf32>
    %cst_8 = arith.constant dense<0.000000e+00> : vector<8x256xf32>
    %9 = tpu.matmul %7, %8, %cst_8 {dimension_numbers = #tpu.dot_dimension_numbers<[1], [0], [0], [1], [0, 0, 1, 1], [], []>} : vector<8x256xf32>, vector<256x256xf32>, vector<8x256xf32> -> vector<8x256xf32>
    %c0_9 = arith.constant 0 : index
    %c0_10 = arith.constant 0 : index
    %10 = vector.load %arg5[%c0_9, %c0_10] : memref<1x256xf32, #tpu.memory_space<vmem>>, vector<1x256xf32>
    %11 = vector.broadcast %10 : vector<1x256xf32> to vector<8x256xf32>
    %12 = arith.addf %9, %11 : vector<8x256xf32>
    %cst_11 = arith.constant 0.000000e+00 : f32
    %13 = vector.broadcast %cst_11 : f32 to vector<8x256xf32>
    %14 = arith.maximumf %12, %13 : vector<8x256xf32>
    %c0_12 = arith.constant 0 : index
    %c0_13 = arith.constant 0 : index
    %15 = vector.load %arg6[%c0_12, %c0_13] : memref<256x128xf32, #tpu.memory_space<vmem>>, vector<256x128xf32>
    %cst_14 = arith.constant dense<0.000000e+00> : vector<8x128xf32>
    %16 = tpu.matmul %14, %15, %cst_14 {dimension_numbers = #tpu.dot_dimension_numbers<[1], [0], [0], [1], [0, 0, 1, 1], [], []>} : vector<8x256xf32>, vector<256x128xf32>, vector<8x128xf32> -> vector<8x128xf32>
    %c0_15 = arith.constant 0 : index
    %c0_16 = arith.constant 0 : index
    %17 = vector.load %arg7[%c0_15, %c0_16] : memref<1x128xf32, #tpu.memory_space<vmem>>, vector<1x128xf32>
    %18 = vector.broadcast %17 : vector<1x128xf32> to vector<8x128xf32>
    %19 = arith.addf %16, %18 : vector<8x128xf32>
    %20 = tpu.iota {dimensions = array<i32: 1>} : vector<8x128xi32>
    %c8_i32 = arith.constant 8 : i32
    %21 = vector.broadcast %c8_i32 : i32 to vector<8x128xi32>
    %22 = arith.cmpi sge, %20, %21 : vector<8x128xi32>
    %c16_i32 = arith.constant 16 : i32
    %23 = vector.broadcast %c16_i32 : i32 to vector<8x128xi32>
    %24 = arith.cmpi slt, %20, %23 : vector<8x128xi32>
    %25 = arith.andi %22, %24 : vector<8x128xi1>
    %26 = math.tanh %19 : vector<8x128xf32>
    %cst_17 = arith.constant 3.500000e+00 : f32
    %27 = vector.broadcast %cst_17 : f32 to vector<8x128xf32>
    %28 = arith.mulf %27, %26 : vector<8x128xf32>
    %cst_18 = arith.constant -1.500000e+00 : f32
    %29 = vector.broadcast %cst_18 : f32 to vector<8x128xf32>
    %30 = arith.addf %28, %29 : vector<8x128xf32>
    %31 = arith.select %25, %30, %19 : vector<8x128xi1>, vector<8x128xf32>
    %c0_19 = arith.constant 0 : index
    %c0_20 = arith.constant 0 : index
    %32 = vector.load %arg8[%c0_19, %c0_20] : memref<8x128xf32, #tpu.memory_space<vmem>>, vector<8x128xf32>
    tpu.vector_store %arg8[%c0_19, %c0_20], %31 {strides = array<i32>} : memref<8x128xf32, #tpu.memory_space<vmem>>, vector<8x128xf32>,
    return
  }
  func.func @transform_0(%arg0: i32) -> (i32, i32) {
    %c0_i32 = arith.constant 0 : i32
    %c0_i32_0 = arith.constant 0 : i32
    return %arg0, %c0_i32 : i32, i32
  }
  func.func @transform_1(%arg0: i32) -> (i32, i32) {
    %c0_i32 = arith.constant 0 : i32
    %c0_i32_0 = arith.constant 0 : i32
    %c0_i32_1 = arith.constant 0 : i32
    return %c0_i32, %c0_i32_0 : i32, i32
  }
  func.func @transform_2(%arg0: i32) -> (i32, i32) {
    %c0_i32 = arith.constant 0 : i32
    %c0_i32_0 = arith.constant 0 : i32
    %c0_i32_1 = arith.constant 0 : i32
    return %c0_i32, %c0_i32_0 : i32, i32
  }
  func.func @transform_3(%arg0: i32) -> (i32, i32) {
    %c0_i32 = arith.constant 0 : i32
    %c0_i32_0 = arith.constant 0 : i32
    %c0_i32_1 = arith.constant 0 : i32
    return %c0_i32, %c0_i32_0 : i32, i32
  }
  func.func @transform_4(%arg0: i32) -> (i32, i32) {
    %c0_i32 = arith.constant 0 : i32
    %c0_i32_0 = arith.constant 0 : i32
    %c0_i32_1 = arith.constant 0 : i32
    return %c0_i32, %c0_i32_0 : i32, i32
  }
  func.func @transform_5(%arg0: i32) -> (i32, i32) {
    %c0_i32 = arith.constant 0 : i32
    %c0_i32_0 = arith.constant 0 : i32
    %c0_i32_1 = arith.constant 0 : i32
    return %c0_i32, %c0_i32_0 : i32, i32
  }
  func.func @transform_6(%arg0: i32) -> (i32, i32) {
    %c0_i32 = arith.constant 0 : i32
    %c0_i32_0 = arith.constant 0 : i32
    %c0_i32_1 = arith.constant 0 : i32
    return %c0_i32, %c0_i32_0 : i32, i32
  }
  func.func @transform_7(%arg0: i32) -> (i32, i32) {
    %c0_i32 = arith.constant 0 : i32
    %c0_i32_0 = arith.constant 0 : i32
    return %arg0, %c0_i32 : i32, i32
  }
}

</mosaic_0001>

<bundles_post_ra>
// kernel: tpu_custom_call.1
= control target key start
LH: loop header
LB: loop body
LE: loop exit
PB: predicated region body
PF: predicated region fallthrough
CT: control target
= control target key end

     0   :  { %12 = vsyncpa [#allocation3], 0  ;;  %s859_s0 = inlined_call_operand.hbm [shape: f32[8,32], index: 0, kind: input, shape index: {}]   ;;  %s860_s1 = inlined_call_operand.hbm [shape: f32[32,256], index: 1, kind: input, shape index: {}]   ;;  %s861_s2 = inlined_call_operand.vmem [shape: f32[1,256], index: 2, kind: input, shape index: {}]   ;;  %s862_s3 = inlined_call_operand.hbm [shape: f32[256,256], index: 3, kind: input, shape index: {}]   ;;  %s863_s4 = inlined_call_operand.vmem [shape: f32[1,256], index: 4, kind: input, shape index: {}]   ;;  %s864_s5 = inlined_call_operand.hbm [shape: f32[256,128], index: 5, kind: input, shape index: {}]   ;;  %s865_s6 = inlined_call_operand.vmem [shape: f32[1,128], index: 6, kind: input, shape index: {}]   ;;  %s866_s7 = inlined_call_operand.hbm [shape: f32[8,128], index: 7, kind: output, shape index: {}]  }
   0x1   :  { %13 = vsyncpa [#allocation6], 0 }
   0x2   :  { %14 = vsyncpa [#allocation9], 0 }
   0x3   :  { %15 = vsyncpa [#allocation4], 0  ;;  %s734_s24 = smov [#allocation5]   ;;  %s616_s28 = scalar_lea.hbm %s860_s1, 1024 }
   0x4   :  { %s31_s25 = sshll.u32 %s734_s24, 4  ;;  %p617_p0 = scmp.ne.s32.totalorder %s860_s1, %s616_s28  ;;  %s32_s25 = int_to_ptr.vmem [resolvable:$true] %s31_s25 }
   0x5   :  { %p620_p1 = scmp.lt.u32.totalorder %s616_s28, %s860_s1 }
   0x7   :  { %p622_p2 = pnand %p620_p1, %p617_p0 }
   0x9   :  { %625 = shalt.err (!%p622_p2)
}
   0xa   :  { %s626_s10 = scalar_lea.vmem %s32_s25, 1024  ;;  %p631_p4 = scmp.lt.s32.totalorder %s32_s25, %s32_s25 }
   0xb   :  { %p627_p3 = scmp.ne.s32.totalorder %s32_s25, %s626_s10  ;;  %p632_p5 = scmp.lt.s32.totalorder %s626_s10, %s626_s10 }
   0xd   :  { %p633_p6 = por %p632_p5, %p631_p4 }
   0xf   :  { %p634_p7 = pnand %p633_p6, %p627_p3 }
  0x11   :  { %637 = shalt.err (!%p634_p7)
}
  0x12   :  { %s735_s11 = smov 256   ;;  %s736_s12 = smov 16  }
  0x13   :  { %37 = dma.hbm_to_vmem [thread:$0]  %s860_s1, 1024, %s32_s25, [#allocation6], %s735_s11, %s735_s11, %s736_s12  }
  0x14   :  { %s737_s15 = smov [#allocation2]   ;;  %s738_s17 = smov [#allocation7]  }
  0x15   :  { %s22_s16 = sshll.u32 %s737_s15, 4  ;;  %s45_s18 = sshll.u32 %s738_s17, 4  ;;  %s23_s16 = int_to_ptr.vmem [resolvable:$true] %s22_s16  ;;  %s46_s18 = int_to_ptr.vmem [resolvable:$true] %s45_s18 }
  0x16   :  { %s638_s21 = scalar_lea.hbm %s859_s0, 128 }
  0x17   :  { %p639_p8 = scmp.ne.s32.totalorder %s859_s0, %s638_s21  ;;  %p642_p9 = scmp.lt.u32.totalorder %s638_s21, %s859_s0 }
  0x19   :  { %p644_p10 = pnand %p642_p9, %p639_p8 }
  0x1b   :  { %647 = shalt.err (!%p644_p10)
}
  0x1c   :  { %s648_s1 = scalar_lea.vmem %s23_s16, 128  ;;  %p653_p12 = scmp.lt.s32.totalorder %s23_s16, %s23_s16 }
  0x1d   :  { %p649_p11 = scmp.ne.s32.totalorder %s23_s16, %s648_s1  ;;  %p654_p13 = scmp.lt.s32.totalorder %s648_s1, %s648_s1 }
  0x1f   :  { %p655_p0 = por %p654_p13, %p653_p12 }
  0x21   :  { %p656_p1 = pnand %p655_p0, %p649_p11 }
  0x23   :  { %659 = shalt.err (!%p656_p1)
}
  0x24   :  { %25 = dma.hbm_to_vmem [thread:$0]  %s859_s0, 128, %s23_s16, [#allocation3]  }
  0x25   :  { %s660_s30 = scalar_lea.hbm %s862_s3, 8192 }
  0x26   :  { %p661_p2 = scmp.ne.s32.totalorder %s862_s3, %s660_s30  ;;  %p664_p3 = scmp.lt.u32.totalorder %s660_s30, %s862_s3 }
  0x28   :  { %p666_p4 = pnand %p664_p3, %p661_p2 }
  0x2a   :  { %669 = shalt.err (!%p666_p4)
}
  0x2b   :  { %s670_s14 = scalar_lea.vmem %s46_s18, 8192  ;;  %p675_p6 = scmp.lt.s32.totalorder %s46_s18, %s46_s18 }
  0x2c   :  { %p671_p5 = scmp.ne.s32.totalorder %s46_s18, %s670_s14  ;;  %p676_p7 = scmp.lt.s32.totalorder %s670_s14, %s670_s14 }
  0x2e   :  { %p677_p8 = por %p676_p7, %p675_p6 }
  0x30   :  { %p678_p9 = pnand %p677_p8, %p671_p5 }
  0x32   :  { %681 = shalt.err (!%p678_p9)
}
  0x33   :  { %51 = dma.hbm_to_vmem [thread:$0]  %s862_s3, 8192, %s46_s18, [#allocation6], %s735_s11, %s735_s11, %s736_s12  }
  0x34   :  { %s739_s16 = smov [#allocation8]   ;;  %s682_s21 = scalar_lea.hbm %s864_s5, 4096 }
  0x35   :  { %s59_s17 = sshll.u32 %s739_s16, 4  ;;  %p683_p10 = scmp.ne.s32.totalorder %s864_s5, %s682_s21  ;;  %s60_s17 = int_to_ptr.vmem [resolvable:$true] %s59_s17 }
  0x36   :  { %p686_p11 = scmp.lt.u32.totalorder %s682_s21, %s864_s5 }
  0x38   :  { %p688_p12 = pnand %p686_p11, %p683_p10 }
  0x3a   :  { %691 = shalt.err (!%p688_p12)
}
  0x3b   :  { %s692_s1 = scalar_lea.vmem %s60_s17, 4096  ;;  %p697_p0 = scmp.lt.s32.totalorder %s60_s17, %s60_s17 }
  0x3c   :  { %p693_p13 = scmp.ne.s32.totalorder %s60_s17, %s692_s1  ;;  %p698_p1 = scmp.lt.s32.totalorder %s692_s1, %s692_s1 }
  0x3e   :  { %p699_p2 = por %p698_p1, %p697_p0 }
  0x40   :  { %p700_p3 = pnand %p699_p2, %p693_p13 }
  0x42   :  { %703 = shalt.err (!%p700_p3)
}
  0x43   :  { %s740_s3 = smov 128   ;;  %s741_s11 = smov 8  }
  0x44   :  { %65 = dma.hbm_to_vmem [thread:$0]  %s864_s5, 4096, %s60_s17, [#allocation9], %s740_s3, %s740_s3, %s741_s11  }
  0x45   :  { %726 = dma.done.wait [#allocation3], 128  }
  0x46   :  { %727 = vsyncadd [#allocation3], 4294967168 }
  0x47   :  { %728 = dma.done.wait [#allocation6], 9216  }
  0x48   :  { %729 = vsyncadd [#allocation6], 4294958080 }
  0x49   :  { %730 = dma.done.wait [#allocation9], 4096  }
  0x4a   :  { %731 = vsyncadd [#allocation9], 4294963200  ;;  %v742_v0 = vmov 0.0   ;;  %v82_v1 = vld [vmem:[#allocation5 + $0x8] sm:$0xff]  ;;  %v84_v2 = vld [vmem:[#allocation5 + $0x18] sm:$0xff]  ;;  %vm101_vm0 = vcmask 261120  }
  0x4b   :  { %169 = vmatprep.mubr.f32.mxu0 %v742_v0  ;;  %v81_v3 = vld [vmem:[#allocation5] sm:$0xff]  ;;  %v500_v4 = vpack.c.bf16 %v84_v2, %v82_v1  ;;  %v83_v5 = vld [vmem:[#allocation5 + $0x10] sm:$0xff]  ;;  %v86_v6 = vld [vmem:[#allocation5 + $0x28] sm:$0xff] }
  0x4c   :  { %v88_v7 = vld [vmem:[#allocation5 + $0x38] sm:$0xff]  ;;  %v502_v8 = vpack.c.bf16 %v83_v5, %v81_v3  ;;  %v85_v10 = vld [vmem:[#allocation5 + $0x20] sm:$0xff]  ;;  %v87_v11 = vld [vmem:[#allocation5 + $0x30] sm:$0xff] }
  0x4d   :  { %v504_v9 = vpack.c.bf16 %v88_v7, %v86_v6  ;;  %501 = vmatprep.subr.bf16.mxu0 %v500_v4  ;;  %v179_v12 = vld [vmem:[#allocation7 + $0x8] sm:$0xff]  ;;  %v181_v13 = vld [vmem:[#allocation7 + $0x18] sm:$0xff]  ;;  %v178_v14 = vld [vmem:[#allocation7] sm:$0xff]  ;;  %v506_v15 = vpack.c.bf16 %v87_v11, %v85_v10 }
  0x4e   :  { %503 = vmatpush1.bf16.msra.mxu0 %v502_v8  ;;  %v508_v16 = vpack.c.bf16 %v181_v13, %v179_v12  ;;  %v180_v17 = vld [vmem:[#allocation7 + $0x10] sm:$0xff]  ;;  %v183_v18 = vld [vmem:[#allocation7 + $0x28] sm:$0xff]  ;;  %v185_v19 = vld [vmem:[#allocation7 + $0x38] sm:$0xff] }
  0x4f   :  { %505 = vmatprep.subr.bf16.mxu0 %v504_v9  ;;  %v510_v20 = vpack.c.bf16 %v180_v17, %v178_v14  ;;  %v512_v21 = vpack.c.bf16 %v185_v19, %v183_v18  ;;  %v182_v22 = vld [vmem:[#allocation7 + $0x20] sm:$0xff]  ;;  %v184_v23 = vld [vmem:[#allocation7 + $0x30] sm:$0xff]  ;;  %v187_v24 = vld [vmem:[#allocation7 + $0x48] sm:$0xff] }
  0x50   :  { %509 = vmatprep.subr.bf16.mxu1 %v508_v16  ;;  %v189_v25 = vld [vmem:[#allocation7 + $0x58] sm:$0xff]  ;;  %v514_v26 = vpack.c.bf16 %v184_v23, %v182_v22  ;;  %v186_v29 = vld [vmem:[#allocation7 + $0x40] sm:$0xff]  ;;  %v188_v30 = vld [vmem:[#allocation7 + $0x50] sm:$0xff] }
  0x51   :  { %511 = vmatpush1.bf16.msra.mxu1 %v510_v20  ;;  %v80_v27 = vld [vmem:[#allocation2] sm:$0xff]  ;;  %v516_v28 = vpack.c.bf16 %v189_v25, %v187_v24  ;;  %v191_v31 = vld [vmem:[#allocation7 + $0x68] sm:$0xff]  ;;  %v518_v33 = vpack.c.bf16 %v188_v30, %v186_v29  ;;  %v190_v35 = vld [vmem:[#allocation7 + $0x60] sm:$0xff] }
  0x52   :  { %507 = vmatpush1.bf16.msra.mxu0 %v506_v15  ;;  %513 = vmatprep.subr.bf16.mxu1 %v512_v21  ;;  %v193_v32 = vld [vmem:[#allocation7 + $0x78] sm:$0xff]  ;;  %v192_v36 = vld [vmem:[#allocation7 + $0x70] sm:$0xff]  ;;  %v195_v37 = vld [vmem:[#allocation7 + $0x88] sm:$0xff] }
  0x53   :  { %v520_v34 = vpack.c.bf16 %v193_v32, %v191_v31  ;;  %v197_v38 = vld [vmem:[#allocation7 + $0x98] sm:$0xff]  ;;  %v522_v39 = vpack.c.bf16 %v192_v36, %v190_v35  ;;  %v194_v41 = vld [vmem:[#allocation7 + $0x80] sm:$0xff]  ;;  %v196_v42 = vld [vmem:[#allocation7 + $0x90] sm:$0xff] }
  0x54   :  { %v524_v40 = vpack.c.bf16 %v197_v38, %v195_v37  ;;  %v199_v43 = vld [vmem:[#allocation7 + $0xa8] sm:$0xff]  ;;  %v201_v44 = vld [vmem:[#allocation7 + $0xb8] sm:$0xff]  ;;  %v526_v45 = vpack.c.bf16 %v196_v42, %v194_v41  ;;  %v198_v47 = vld [vmem:[#allocation7 + $0xa0] sm:$0xff] }
  0x55   :  { %463 = vmatmul.mubr.msk.f32.vlgmr.msra.gmra.mrb[0].mxu0 %vm101_vm0, %v80_v27  ;;  %515 = vmatpush1.bf16.msra.mxu1 %v514_v26  ;;  %v528_v46 = vpack.c.bf16 %v201_v44, %v199_v43  ;;  %v200_v48 = vld [vmem:[#allocation7 + $0xb0] sm:$0xff]  ;;  %v203_v49 = vld [vmem:[#allocation7 + $0xc8] sm:$0xff]  ;;  %v205_v50 = vld [vmem:[#allocation7 + $0xd8] sm:$0xff] }
  0x56   :  { %517 = vmatprep.subr.bf16.mxu1 %v516_v28  ;;  %v530_v51 = vpack.c.bf16 %v200_v48, %v198_v47  ;;  %v532_v52 = vpack.c.bf16 %v205_v50, %v203_v49  ;;  %v202_v53 = vld [vmem:[#allocation7 + $0xc0] sm:$0xff]  ;;  %v204_v54 = vld [vmem:[#allocation7 + $0xd0] sm:$0xff]  ;;  %v207_v55 = vld [vmem:[#allocation7 + $0xe8] sm:$0xff] }
  0x57   :  { %v209_v56 = vld [vmem:[#allocation7 + $0xf8] sm:$0xff]  ;;  %v534_v57 = vpack.c.bf16 %v204_v54, %v202_v53  ;;  %v206_v59 = vld [vmem:[#allocation7 + $0xe0] sm:$0xff]  ;;  %v208_v60 = vld [vmem:[#allocation7 + $0xf0] sm:$0xff] }
  0x58   :  { %v536_v58 = vpack.c.bf16 %v209_v56, %v207_v55  ;;  %v211_v61 = vld [vmem:[#allocation7 + $0x108] sm:$0xff]  ;;  %v213_v62 = vld [vmem:[#allocation7 + $0x118] sm:$0xff]  ;;  %v538_v63 = vpack.c.bf16 %v208_v60, %v206_v59  ;;  %v210_v1 = vld [vmem:[#allocation7 + $0x100] sm:$0xff] }
  0x59   :  { %519 = vmatpush1.bf16.msra.mxu1 %v518_v33  ;;  %v540_v0 = vpack.c.bf16 %v213_v62, %v211_v61  ;;  %v212_v2 = vld [vmem:[#allocation7 + $0x110] sm:$0xff]  ;;  %v215_v3 = vld [vmem:[#allocation7 + $0x128] sm:$0xff]  ;;  %v217_v4 = vld [vmem:[#allocation7 + $0x138] sm:$0xff] }
  0x5a   :  { %521 = vmatprep.subr.bf16.mxu1 %v520_v34  ;;  %v542_v5 = vpack.c.bf16 %v212_v2, %v210_v1  ;;  %v544_v6 = vpack.c.bf16 %v217_v4, %v215_v3  ;;  %v214_v7 = vld [vmem:[#allocation7 + $0x120] sm:$0xff]  ;;  %v216_v8 = vld [vmem:[#allocation7 + $0x130] sm:$0xff]  ;;  %v219_v9 = vld [vmem:[#allocation7 + $0x148] sm:$0xff] }
  0x5b   :  { %v221_v10 = vld [vmem:[#allocation7 + $0x158] sm:$0xff]  ;;  %v546_v11 = vpack.c.bf16 %v216_v8, %v214_v7  ;;  %v218_v13 = vld [vmem:[#allocation7 + $0x140] sm:$0xff]  ;;  %v220_v14 = vld [vmem:[#allocation7 + $0x150] sm:$0xff] }
  0x5c   :  { %v548_v12 = vpack.c.bf16 %v221_v10, %v219_v9  ;;  %v223_v15 = vld [vmem:[#allocation7 + $0x168] sm:$0xff]  ;;  %v225_v16 = vld [vmem:[#allocation7 + $0x178] sm:$0xff]  ;;  %v550_v17 = vpack.c.bf16 %v220_v14, %v218_v13  ;;  %v222_v19 = vld [vmem:[#allocation7 + $0x160] sm:$0xff] }
  0x5d   :  { %523 = vmatpush1.bf16.msra.mxu1 %v522_v39  ;;  %v552_v18 = vpack.c.bf16 %v225_v16, %v223_v15  ;;  %v224_v20 = vld [vmem:[#allocation7 + $0x170] sm:$0xff]  ;;  %v227_v21 = vld [vmem:[#allocation7 + $0x188] sm:$0xff]  ;;  %v229_v22 = vld [vmem:[#allocation7 + $0x198] sm:$0xff] }
  0x5e   :  { %525 = vmatprep.subr.bf16.mxu1 %v524_v40  ;;  %v554_v23 = vpack.c.bf16 %v224_v20, %v222_v19  ;;  %v556_v24 = vpack.c.bf16 %v229_v22, %v227_v21  ;;  %v226_v25 = vld [vmem:[#allocation7 + $0x180] sm:$0xff]  ;;  %v228_v26 = vld [vmem:[#allocation7 + $0x190] sm:$0xff]  ;;  %v231_v27 = vld [vmem:[#allocation7 + $0x1a8] sm:$0xff]  ;;  %v91_v21 = vlaneseq }
  0x5f   :  { %v233_v28 = vld [vmem:[#allocation7 + $0x1b8] sm:$0xff]  ;;  %v558_v29 = vpack.c.bf16 %v228_v26, %v226_v25  ;;  %v230_v31 = vld [vmem:[#allocation7 + $0x1a0] sm:$0xff]  ;;  %v232_v32 = vld [vmem:[#allocation7 + $0x1b0] sm:$0xff] }
  0x60   :  { %v560_v30 = vpack.c.bf16 %v233_v28, %v231_v27  ;;  %v235_v33 = vld [vmem:[#allocation7 + $0x1c8] sm:$0xff]  ;;  %v237_v34 = vld [vmem:[#allocation7 + $0x1d8] sm:$0xff]  ;;  %v562_v35 = vpack.c.bf16 %v232_v32, %v230_v31  ;;  %v234_v37 = vld [vmem:[#allocation7 + $0x1c0] sm:$0xff]  ;;  %v92_v22 = vshrl.u32 %v91_v21, 7 }
  0x61   :  { %527 = vmatpush1.bf16.msra.mxu1 %v526_v45  ;;  %v564_v36 = vpack.c.bf16 %v237_v34, %v235_v33  ;;  %v236_v38 = vld [vmem:[#allocation7 + $0x1d0] sm:$0xff]  ;;  %v239_v40 = vld [vmem:[#allocation7 + $0x1e8] sm:$0xff]  ;;  %v241_v41 = vld [vmem:[#allocation7 + $0x1f8] sm:$0xff] }
  0x62   :  { %529 = vmatprep.subr.bf16.mxu1 %v528_v46  ;;  %v566_v39 = vpack.c.bf16 %v236_v38, %v234_v37  ;;  %v568_v42 = vpack.c.bf16 %v241_v41, %v239_v40  ;;  %v238_v43 = vld [vmem:[#allocation7 + $0x1e0] sm:$0xff]  ;;  %v240_v44 = vld [vmem:[#allocation7 + $0x1f0] sm:$0xff]  ;;  %v344_v47 = vld [vmem:[#allocation8 + $0x88] sm:$0xff]  ;;  %v97_v25 = vsub.s32 1, %v92_v22 }
  0x63   :  { %v570_v45 = vpack.c.bf16 %v240_v44, %v238_v43  ;;  %v343_v46 = vld [vmem:[#allocation8 + $0x80] sm:$0xff]  ;;  %v328_v50 = vld [vmem:[#allocation8 + $0x8] sm:$0xff]  ;;  %v329_v55 = vld [vmem:[#allocation8 + $0x10] sm:$0xff] }
  0x64   :  { %v327_v48 = vld [vmem:[#allocation8] sm:$0xff]  ;;  %v572_v49 = vpack.c.bf16 %v344_v47, %v343_v46  ;;  %v330_v56 = vld [vmem:[#allocation8 + $0x18] sm:$0xff]  ;;  %v332_v62 = vld [vmem:[#allocation8 + $0x28] sm:$0xff] }
  0x65   :  { %531 = vmatpush1.bf16.msra.mxu1 %v530_v51  ;;  %v345_v51 = vld [vmem:[#allocation8 + $0x90] sm:$0xff]  ;;  %v574_v53 = vpack.c.bf16 %v328_v50, %v327_v48  ;;  %v578_v59 = vpack.c.bf16 %v330_v56, %v329_v55  ;;  %v331_v61 = vld [vmem:[#allocation8 + $0x20] sm:$0xff]  ;;  %v334_v4 = vld [vmem:[#allocation8 + $0x38] sm:$0xff] }
  0x66   :  { %533 = vmatprep.subr.bf16.mxu1 %v532_v52  ;;  %v346_v52 = vld [vmem:[#allocation8 + $0x98] sm:$0xff]  ;;  %573 = vmatprep.subr.bf16.mxu0 %v572_v49  ;;  %v582_v1 = vpack.c.bf16 %v332_v62, %v331_v61  ;;  %v333_v3 = vld [vmem:[#allocation8 + $0x30] sm:$0xff]  ;;  %v335_v9 = vld [vmem:[#allocation8 + $0x40] sm:$0xff] }
  0x67   :  { %v576_v54 = vpack.c.bf16 %v346_v52, %v345_v51  ;;  %575 = vmatpush3.bf16.msra.mxu0 %v574_v53  ;;  %v586_v7 = vpack.c.bf16 %v334_v4, %v333_v3  ;;  %v336_v10 = vld [vmem:[#allocation8 + $0x48] sm:$0xff]  ;;  %v337_v15 = vld [vmem:[#allocation8 + $0x50] sm:$0xff]  ;;  %v338_v16 = vld [vmem:[#allocation8 + $0x58] sm:$0xff] }
  0x68   :  { %v590_v13 = vpack.c.bf16 %v336_v10, %v335_v9  ;;  %v594_v19 = vpack.c.bf16 %v338_v16, %v337_v15  ;;  %v339_v34 = vld [vmem:[#allocation8 + $0x60] sm:$0xff]  ;;  %v357_v37 = vld [vmem:[#allocation8 + $0xf0] sm:$0xff]  ;;  %v358_v38 = vld [vmem:[#allocation8 + $0xf8] sm:$0xff] }
  0x69   :  { %535 = vmatpush1.bf16.msra.mxu1 %v534_v57  ;;  %v347_v57 = vld [vmem:[#allocation8 + $0xa0] sm:$0xff]  ;;  %577 = vmatprep.subr.bf16.mxu0 %v576_v54  ;;  %v341_v40 = vld [vmem:[#allocation8 + $0x70] sm:$0xff]  ;;  %v342_v41 = vld [vmem:[#allocation8 + $0x78] sm:$0xff] }
  0x6a   :  { %537 = vmatprep.subr.bf16.mxu1 %v536_v58  ;;  %v348_v58 = vld [vmem:[#allocation8 + $0xa8] sm:$0xff]  ;;  %v242_v43 = vld [vmem:[%s863_s4] sm:$0x3]  ;;  %s743_s4 = smov [#allocation10]  }
  0x6b   :  { %v580_v60 = vpack.c.bf16 %v348_v58, %v347_v57  ;;  %579 = vmatpush3.bf16.msra.mxu0 %v578_v59  ;;  %v464_v53 = vld [vmem:[%s865_s6] ss:$0 sm:$0xff]  ;;  %v437_v57 = vand.u32 127, %v91_v21  ;;  %s452_s30 = sshll.u32 %s743_s4, 4  ;;  %s453_s30 = int_to_ptr.vmem [resolvable:$true] %s452_s30 }
  0x6c   :  { %s704_s8 = scalar_lea.vmem %s453_s30, 128  ;;  %p709_p5 = scmp.lt.s32.totalorder %s453_s30, %s453_s30 }
  0x6d   :  { %539 = vmatpush1.bf16.msra.mxu1 %v538_v63  ;;  %v349_v63 = vld [vmem:[#allocation8 + $0xb0] sm:$0xff]  ;;  %581 = vmatprep.subr.bf16.mxu0 %v580_v60  ;;  %vm438_vm1 = vcmp.ge.s32.totalorder %v437_v57, 8  ;;  %vm439_vm2 = vcmp.lt.s32.totalorder %v437_v57, 16  ;;  %p705_p4 = scmp.ne.s32.totalorder %s453_s30, %s704_s8  ;;  %p710_p6 = scmp.lt.s32.totalorder %s704_s8, %s704_s8 }
  0x6e   :  { %541 = vmatprep.subr.bf16.mxu1 %v540_v0  ;;  %v350_v0 = vld [vmem:[#allocation8 + $0xb8] sm:$0xff]  ;;  %vm440_vm3 = vmand %vm438_vm1, %vm439_vm2 }
  0x6f   :  { %v584_v2 = vpack.c.bf16 %v350_v0, %v349_v63  ;;  %583 = vmatpush3.bf16.msra.mxu0 %v582_v1  ;;  %p711_p7 = por %p710_p6, %p709_p5 }
  0x71   :  { %543 = vmatpush1.bf16.msra.mxu1 %v542_v5  ;;  %v351_v5 = vld [vmem:[#allocation8 + $0xc0] sm:$0xff]  ;;  %585 = vmatprep.subr.bf16.mxu0 %v584_v2  ;;  %p712_p8 = pnand %p711_p7, %p705_p4 }
  0x72   :  { %545 = vmatprep.subr.bf16.mxu1 %v544_v6  ;;  %v352_v6 = vld [vmem:[#allocation8 + $0xc8] sm:$0xff] }
  0x73   :  { %v588_v8 = vpack.c.bf16 %v352_v6, %v351_v5  ;;  %587 = vmatpush3.bf16.msra.mxu0 %v586_v7 }
  0x75   :  { %547 = vmatpush1.bf16.msra.mxu1 %v546_v11  ;;  %v353_v11 = vld [vmem:[#allocation8 + $0xd0] sm:$0xff]  ;;  %589 = vmatprep.subr.bf16.mxu0 %v588_v8 }
  0x76   :  { %549 = vmatprep.subr.bf16.mxu1 %v548_v12  ;;  %v354_v12 = vld [vmem:[#allocation8 + $0xd8] sm:$0xff] }
  0x77   :  { %v592_v14 = vpack.c.bf16 %v354_v12, %v353_v11  ;;  %591 = vmatpush3.bf16.msra.mxu0 %v590_v13 }
  0x79   :  { %551 = vmatpush1.bf16.msra.mxu1 %v550_v17  ;;  %v355_v17 = vld [vmem:[#allocation8 + $0xe0] sm:$0xff]  ;;  %593 = vmatprep.subr.bf16.mxu0 %v592_v14 }
  0x7a   :  { %553 = vmatprep.subr.bf16.mxu1 %v552_v18  ;;  %v356_v18 = vld [vmem:[#allocation8 + $0xe8] sm:$0xff] }
  0x7b   :  { %v596_v20 = vpack.c.bf16 %v356_v18, %v355_v17  ;;  %595 = vmatpush3.bf16.msra.mxu0 %v594_v19 }
  0x7d   :  { %555 = vmatpush1.bf16.msra.mxu1 %v554_v23  ;;  %597 = vmatprep.subr.bf16.mxu0 %v596_v20  ;;  %v93_v23 = vsub.s32 0, %v92_v22 }
  0x7e   :  { %557 = vmatprep.subr.bf16.mxu1 %v556_v24  ;;  %v89_v24 = vld [vmem:[%s861_s2] sm:$0x3] }
  0x7f   :  { %v94_v26 = vrot.slane %v89_v24, %v93_v23  ;;  %v98_v27 = vrot.slane %v89_v24, %v97_v25  ;;  %v247_v44 = vrot.slane %v242_v43, %v93_v23 }
  0x81   :  { %559 = vmatpush1.bf16.msra.mxu1 %v558_v29 }
  0x82   :  { %561 = vmatprep.subr.bf16.mxu1 %v560_v30 }
  0x85   :  { %563 = vmatpush1.bf16.msra.mxu1 %v562_v35  ;;  %v340_v35 = vld [vmem:[#allocation8 + $0x68] sm:$0xff] }
  0x86   :  { %565 = vmatprep.subr.bf16.mxu1 %v564_v36  ;;  %v598_v36 = vpack.c.bf16 %v340_v35, %v339_v34 }
  0x88   :  { %599 = vmatpush3.bf16.msra.mxu0 %v598_v36 }
  0x89   :  { %567 = vmatpush1.bf16.msra.mxu1 %v566_v39  ;;  %v600_v39 = vpack.c.bf16 %v358_v38, %v357_v37 }
  0x8a   :  { %569 = vmatprep.subr.bf16.mxu1 %v568_v42  ;;  %v602_v42 = vpack.c.bf16 %v342_v41, %v341_v40 }
  0x8b   :  { %601 = vmatprep.subr.bf16.mxu0 %v600_v39 }
  0x8c   :  { %603 = vmatpush3.bf16.msra.mxu0 %v602_v42 }
  0x8d   :  { %571 = vmatpush1.bf16.msra.mxu1 %v570_v45  ;;  %v251_v45 = vrot.slane %v242_v43, %v97_v25 }
 0x128   :  { %v171_v28 = vpop.f32.mrb[0].mxu0 }
 0x129   :  { %v172_v29 = vadd.f32 %v171_v28, %v94_v26  ;;  %v173_v30 = vpop.f32.mrb[1].mxu0 }
 0x12a   :  { %v174_v31 = vadd.f32 %v173_v30, %v98_v27 }
 0x12b   :  { %v176_v33 = vmax.f32 %v172_v29, 0.0 }
 0x12c   :  { %v177_v32 = vmax.f32 %v174_v31, 0.0 }
 0x12e   :  { %318 = vmatprep.mubr.f32.mxu1 %v177_v32 }
 0x12f   :  { %319 = vmatmul.mubr.f32.vlgmr.msra.gmra.mrb[0].mxu1 %v176_v33 }
 0x202   :  { %v320_v46 = vpop.f32.mrb[0].mxu1 }
 0x203   :  { %v321_v47 = vadd.f32 %v320_v46, %v247_v44  ;;  %v322_v48 = vpop.f32.mrb[1].mxu1 }
 0x204   :  { %v323_v49 = vadd.f32 %v322_v48, %v251_v45 }
 0x205   :  { %v325_v51 = vmax.f32 %v321_v47, 0.0 }
 0x206   :  { %v326_v50 = vmax.f32 %v323_v49, 0.0 }
 0x208   :  { %430 = vmatprep.mubr.f32.mxu0 %v326_v50 }
 0x209   :  { %431 = vmatmul.mubr.f32.vlgmr.msra.gmra.mrb[2].mxu0 %v325_v51 }
 0x2dc   :  { %v497_v52 = vpop.f32.mrb[2].mxu0 }
 0x2dd   :  { %v498_v54 = vpop.f32.mrb[3].mxu0 }
 0x2de   :  { %v499_v55 = vadd.f32 %v498_v54, %v497_v52 }
 0x2e0   :  { %v433_v56 = vadd.f32 %v499_v55, %v464_v53 }
 0x2e2   :  { %614 = vtanh.f32 %v433_v56 }
 0x2ec   :  { %v615_v58 = vpop.eup %614 }
 0x2ed   :  { %v442_v59 = vmul.f32 3.5, %v615_v58 }
 0x2ef   :  { %v443_v60 = vadd.f32 -1.5, %v442_v59 }
 0x2f1   :  { %v444_v61 = vsel %vm440_vm3, %v443_v60, %v433_v56 }
 0x2f2   :  { %445 = vst [vmem:[#allocation10] sm:$0xff] %v444_v61 }
 0x2f3   :  { %715 = shalt.err (!%p712_p8)
}
 0x2f4   :  { %s716_s10 = scalar_lea.hbm %s866_s7, 128 }
 0x2f5   :  { %p717_p9 = scmp.ne.s32.totalorder %s866_s7, %s716_s10  ;;  %p720_p10 = scmp.lt.u32.totalorder %s716_s10, %s866_s7 }
 0x2f7   :  { %p722_p11 = pnand %p720_p10, %p717_p9 }
 0x2f9   :  { %725 = shalt.err (!%p722_p11)
}
 0x2fa   :  { %455 = dma.vmem_to_hbm [thread:$0]  %s453_s30, 128, %s866_s7, [#allocation4]  }
 0x2fb   :  { %732 = dma.done.wait [#allocation4], 128  }
 0x2fc   :  { %733 = vsyncadd [#allocation4], 4294967168 }
 0x2fd   :  { %459 = vsyncpa [#allocation3], 1 }
 0x2fe   :  { %460 = vsyncpa [#allocation6], 1 }
 0x2ff   :  { %461 = vsyncpa [#allocation9], 1 }
 0x300   :  { %462 = vsyncpa [#allocation4], 1 }

</bundles_post_ra>
